<compile_context>
chip_gen: v7x
topology: tpu7x:2x2x1
jax: 0.10.0
libtpu: 0.0.40
codegen_flags: <defaults>
</compile_context>

<pallas_src>
import jax
import jax.numpy as jnp
from jax import lax
from jax.experimental import pallas as pl
from jax.experimental.pallas import tpu as pltpu


# --------------------------------------------------------------------------
# Kernel 1: blocked batched RHS evaluation
#   dy[s] = tanh(y[s] @ W + b)   for S_BLK evaluation points per grid step.
# --------------------------------------------------------------------------
def ode_rhs_kernel(y_ref, w_ref, b_ref, dy_ref):
    # y_ref  : (S_BLK, B, D) input-dtype state tile
    # w_ref  : (D, D)        bf16 weights (VMEM-resident across the grid)
    # b_ref  : (1, D)        f32 bias     (VMEM-resident across the grid)
    # dy_ref : (S_BLK, B, D) output dy/dt
    s_blk, bsz, d = y_ref.shape
    # Collapse leading dims -> (S_BLK*B, D); free (trailing dims (8,128)-aligned).
    y = y_ref[...].reshape(s_blk * bsz, d).astype(jnp.bfloat16)   # in-kernel cast
    acc = jnp.dot(y, w_ref[...], preferred_element_type=jnp.float32)   # MXU
    dy = jnp.tanh(acc + b_ref[...])                               # f32 VPU/EUP
    dy_ref[...] = dy.reshape(s_blk, bsz, d).astype(dy_ref.dtype)


def _pick_s_blk(S, B, D, in_bytes, out_bytes, target_m=256,
                vmem_budget=48 << 20):
    """S_BLK so the matmul M = S_BLK*B >= target_m, within a v7x-safe VMEM budget."""
    s_blk = max(1, target_m // B)
    s_blk = min(s_blk, S)
    resident = 2 * D * D + 4 * D                    # bf16 W + f32 b
    while s_blk > 1:
        tiles = 2 * s_blk * B * D * (in_bytes + out_bytes)   # double-buffered in+out
        if resident + tiles <= vmem_budget:
            break
        s_blk //= 2
    return s_blk


def ode_func_many(ts, ys, W, b, *, out_dtype=None):
    """Evaluate dy/dt = f(t_s, y_s) for S evaluation points in one launch.

    ts: (S,) times (unused: autonomous RHS, kept for module-signature parity),
    ys: (S, B, D) states, W: (D, D), b: (1, D) or (D,).
    Returns (S, B, D) derivatives in out_dtype (default: ys.dtype).
    """
    del ts  # autonomous RHS
    S, B, D = ys.shape
    assert D % 128 == 0, "pad state_dim to a multiple of 128 (lane-dense)"
    assert B % 8 == 0, "pad batch to a multiple of 8 (sublane-dense)"
    out_dtype = ys.dtype if out_dtype is None else out_dtype

    s_blk = _pick_s_blk(S, B, D, jnp.dtype(ys.dtype).itemsize,
                        jnp.dtype(out_dtype).itemsize)
    s_pad = pl.cdiv(S, s_blk) * s_blk
    if s_pad != S:
        ys = jnp.pad(ys, ((0, s_pad - S), (0, 0), (0, 0)))

    w_bf = jnp.asarray(W).astype(jnp.bfloat16)          # tiny, VMEM-resident
    b_f32 = jnp.asarray(b, jnp.float32).reshape(1, D)   # pre-cast bias once

    out = pl.pallas_call(
        ode_rhs_kernel,
        out_shape=jax.ShapeDtypeStruct((s_pad, B, D), out_dtype),
        grid=(s_pad // s_blk,),
        in_specs=[
            pl.BlockSpec((s_blk, B, D), lambda s: (s, 0, 0)),  # y tile
            pl.BlockSpec((D, D), lambda s: (0, 0)),            # W resident
            pl.BlockSpec((1, D), lambda s: (0, 0)),            # b resident
        ],
        out_specs=pl.BlockSpec((s_blk, B, D), lambda s: (s, 0, 0)),
        compiler_params=pltpu.CompilerParams(
            dimension_semantics=("parallel",),  # independent evals -> 2 TCs on v7x
        ),
    )(ys, w_bf, b_f32)
    return out[:S] if s_pad != S else out


def ode_func(t, y, W, b):
    """forward(t, y) -> dy/dt  (single evaluation; same semantics as the module)."""
    ts = jnp.asarray(t, jnp.float32).reshape(1)
    return ode_func_many(ts, y[None], W, b)[0]


# --------------------------------------------------------------------------
# Kernel 2: fully fused forward-Euler integration.
#   Step loop is an in-kernel fori_loop (no per-step grid overhead); grid is
#   over batch tiles ("parallel") so v7x can use both TensorCores.
# --------------------------------------------------------------------------
def euler_kernel(ts_ref, y0_ref, w_ref, b_ref, yout_ref):
    # ts_ref : (n_steps+1,) f32 SMEM (scalar prefetch) time grid
    # y0_ref : (B_BLK, D) initial state tile, w_ref: (D, D) bf16, b_ref: (1, D) f32
    n_steps = ts_ref.shape[0] - 1           # static
    w = w_ref[...]                          # hoisted out of the loop
    bias = b_ref[...]                       # hoisted (JAX won't CSE broadcasts)

    def step(i, y):
        dt = ts_ref[i + 1] - ts_ref[i]      # SMEM scalar reads
        acc = jnp.dot(y.astype(jnp.bfloat16), w,
                      preferred_element_type=jnp.float32)   # MXU bf16 -> f32
        dy = jnp.tanh(acc + bias)           # f32 epilogue
        return y + dt * dy

    y = lax.fori_loop(0, n_steps, step, y0_ref[...].astype(jnp.float32),
                      unroll=2)
    yout_ref[...] = y.astype(yout_ref.dtype)


def euler_integrate(ts_grid, y0, W, b):
    """Integrate dy/dt = tanh(y @ W + b) with forward Euler over ts_grid.

    ts_grid: (n_steps + 1,) time grid, y0: (B, D).  Returns y(T) of shape (B, D).
    """
    ts_grid = jnp.asarray(ts_grid, jnp.float32)
    n_steps = ts_grid.shape[0] - 1
    assert n_steps >= 1, "need at least one Euler step (ts_grid length >= 2)"
    B, D = y0.shape
    assert D % 128 == 0 and B % 8 == 0

    # Split the batch across two tiles when possible so v7x's two TensorCores
    # each integrate half (no effect on single-TC v5e/v6e).
    n_btiles = 2 if B % 16 == 0 else 1
    b_blk = B // n_btiles

    w_bf = jnp.asarray(W).astype(jnp.bfloat16)
    b_f32 = jnp.asarray(b, jnp.float32).reshape(1, D)

    return pl.pallas_call(
        euler_kernel,
        out_shape=jax.ShapeDtypeStruct((B, D), y0.dtype),
        grid_spec=pltpu.PrefetchScalarGridSpec(
            num_scalar_prefetch=1,
            grid=(n_btiles,),
            in_specs=[
                pl.BlockSpec((b_blk, D), lambda i, ts: (i, 0)),   # y0 tile
                pl.BlockSpec((D, D), lambda i, ts: (0, 0)),       # W resident
                pl.BlockSpec((1, D), lambda i, ts: (0, 0)),       # b resident
            ],
            out_specs=pl.BlockSpec((b_blk, D), lambda i, ts: (i, 0)),
        ),
        compiler_params=pltpu.CompilerParams(
            dimension_semantics=("parallel",),
        ),
    )(ts_grid, y0, w_bf, b_f32)


def init_params(state_dim, dtype=jnp.float32):
    """Deterministic synthetic parameters (module __init__ defines none)."""
    key = jax.random.PRNGKey(0)
    kw, kb = jax.random.split(key)
    W = jax.random.normal(kw, (state_dim, state_dim), dtype) * (1.0 / state_dim**0.5)
    b = jax.random.normal(kb, (1, state_dim), dtype) * 0.1
    return W, b


if __name__ == "__main__":
    S, B, D = 32, 8, 128         # 32 eval points -> S_BLK=32, matmul M = 256
    n_steps = 8

    key = jax.random.PRNGKey(0)
    ky, _ = jax.random.split(key)
    ys = jax.random.normal(ky, (S, B, D), jnp.float32)
    ts = jnp.linspace(0.0, 1.0, S).astype(jnp.float32)
    W, b = init_params(D)

    # pure-JAX reference with matching bf16 MXU inputs, f32 accumulate/epilogue
    y_bf = ys.astype(jnp.bfloat16)
    w_bf = W.astype(jnp.bfloat16)
    ref = jnp.tanh(
        jnp.einsum("sbd,de->sbe", y_bf, w_bf, preferred_element_type=jnp.float32) + b
    )

    # ---- batched RHS evaluations (one pallas_call, S_BLK evals per grid step) ----
    dys = jax.block_until_ready(ode_func_many(ts, ys, W, b))
    assert dys.shape == (S, B, D)
    assert jnp.allclose(dys, ref, atol=2e-3, rtol=2e-3)

    # ---- bf16-output path (halved HBM writeback for tolerant consumers) ----
    dys_bf = jax.block_until_ready(
        ode_func_many(ts, ys, W, b, out_dtype=jnp.bfloat16))
    assert dys_bf.dtype == jnp.bfloat16
    assert jnp.allclose(dys_bf.astype(jnp.float32), ref, atol=1e-2, rtol=1e-2)

    # ---- single forward(t, y) call (module semantics) ----
    dy0 = jax.block_until_ready(ode_func(ts[0], ys[0], W, b))
    assert jnp.allclose(dy0, ref[0], atol=2e-3, rtol=2e-3)

    # ---- fused Euler integration (in-kernel step loop, y never hits HBM) ----
    ts_grid = jnp.linspace(0.0, 0.4, n_steps + 1).astype(jnp.float32)
    yT = jax.block_until_ready(euler_integrate(ts_grid, ys[0], W, b))

    y_cur = ys[0].astype(jnp.float32)
    for i in range(n_steps):
        dt = ts_grid[i + 1] - ts_grid[i]
        d = jnp.tanh(
            jnp.dot(y_cur.astype(jnp.bfloat16), w_bf,
                    preferred_element_type=jnp.float32) + b
        )
        y_cur = y_cur + dt * d
    assert yT.shape == (B, D)
    assert jnp.allclose(yT, y_cur, atol=5e-3, rtol=5e-3)

    print("KERNEL_OK")
</pallas_src>

<mosaic_0001>
module attributes {stable_mosaic.version = 11 : i64} {
  func.func @ode_rhs_kernel(%arg0: i32, %arg1: memref<32x8x128xf32, #tpu.memory_space<vmem>>, %arg2: memref<128x128xbf16, #tpu.memory_space<vmem>>, %arg3: memref<1x128xf32, #tpu.memory_space<vmem>>, %arg4: memref<32x8x128xf32, #tpu.memory_space<vmem>>) attributes {dimension_semantics = [#tpu.dimension_semantics<parallel>], iteration_bounds = array<i64: 1>, scalar_prefetch = 0 : i64, scratch_operands = 0 : i64, tpu.core_type = #tpu.core_type<tc>, window_params = [{transform_indices = @transform_0, window_bounds = array<i64: 32, 8, 128>}, {pipeline_mode = #tpu.pipeline_mode<synchronous>, transform_indices = @transform_1, window_bounds = array<i64: 128, 128>}, {pipeline_mode = #tpu.pipeline_mode<synchronous>, transform_indices = @transform_2, window_bounds = array<i64: 1, 128>}, {transform_indices = @transform_3, window_bounds = array<i64: 32, 8, 128>}]} {
    %c0 = arith.constant 0 : index
    %c0_0 = arith.constant 0 : index
    %c0_1 = arith.constant 0 : index
    %0 = vector.load %arg1[%c0, %c0_0, %c0_1] : memref<32x8x128xf32, #tpu.memory_space<vmem>>, vector<32x8x128xf32>
    %1 = vector.shape_cast %0 : vector<32x8x128xf32> to vector<256x128xf32>
    %2 = arith.truncf %1 : vector<256x128xf32> to vector<256x128xbf16>
    %c0_2 = arith.constant 0 : index
    %c0_3 = arith.constant 0 : index
    %3 = vector.load %arg2[%c0_2, %c0_3] : memref<128x128xbf16, #tpu.memory_space<vmem>>, vector<128x128xbf16>
    %cst = arith.constant dense<0.000000e+00> : vector<256x128xf32>
    %4 = tpu.matmul %2, %3, %cst {dimension_numbers = #tpu.dot_dimension_numbers<[1], [0], [0], [1], [0, 0, 1, 1], [], []>} : vector<256x128xbf16>, vector<128x128xbf16>, vector<256x128xf32> -> vector<256x128xf32>
    %c0_4 = arith.constant 0 : index
    %c0_5 = arith.constant 0 : index
    %5 = vector.load %arg3[%c0_4, %c0_5] : memref<1x128xf32, #tpu.memory_space<vmem>>, vector<1x128xf32>
    %6 = vector.broadcast %5 : vector<1x128xf32> to vector<256x128xf32>
    %7 = arith.addf %4, %6 : vector<256x128xf32>
    %8 = math.tanh %7 : vector<256x128xf32>
    %9 = vector.shape_cast %8 : vector<256x128xf32> to vector<32x8x128xf32>
    %c0_6 = arith.constant 0 : index
    %c0_7 = arith.constant 0 : index
    %c0_8 = arith.constant 0 : index
    %10 = vector.load %arg4[%c0_6, %c0_7, %c0_8] : memref<32x8x128xf32, #tpu.memory_space<vmem>>, vector<32x8x128xf32>
    tpu.vector_store %arg4[%c0_6, %c0_7, %c0_8], %9 {strides = array<i32>} : memref<32x8x128xf32, #tpu.memory_space<vmem>>, vector<32x8x128xf32>,
    return
  }
  func.func @transform_0(%arg0: i32) -> (i32, i32, i32) {
    %c0_i32 = arith.constant 0 : i32
    %c0_i32_0 = arith.constant 0 : i32
    %c0_i32_1 = arith.constant 0 : i32
    return %arg0, %c0_i32, %c0_i32_0 : i32, i32, i32
  }
  func.func @transform_1(%arg0: i32) -> (i32, i32) {
    %c0_i32 = arith.constant 0 : i32
    %c0_i32_0 = arith.constant 0 : i32
    %c0_i32_1 = arith.constant 0 : i32
    return %c0_i32, %c0_i32_0 : i32, i32
  }
  func.func @transform_2(%arg0: i32) -> (i32, i32) {
    %c0_i32 = arith.constant 0 : i32
    %c0_i32_0 = arith.constant 0 : i32
    %c0_i32_1 = arith.constant 0 : i32
    return %c0_i32, %c0_i32_0 : i32, i32
  }
  func.func @transform_3(%arg0: i32) -> (i32, i32, i32) {
    %c0_i32 = arith.constant 0 : i32
    %c0_i32_0 = arith.constant 0 : i32
    %c0_i32_1 = arith.constant 0 : i32
    return %arg0, %c0_i32, %c0_i32_0 : i32, i32, i32
  }
}

</mosaic_0001>

<bundles_post_ra>
// kernel: tpu_custom_call.1
= control target key start
LH: loop header
LB: loop body
LE: loop exit
PB: predicated region body
PF: predicated region fallthrough
CT: control target
= control target key end

     0   :  { %8 = vsyncpa [#allocation3], 0  ;;  %s760_s0 = inlined_call_operand.hbm [shape: f32[32,8,128], index: 0, kind: input, shape index: {}]   ;;  %s761_s1 = inlined_call_operand.hbm [shape: bf16[128,128], index: 1, kind: input, shape index: {}]   ;;  %s762_s2 = inlined_call_operand.vmem [shape: f32[1,128], index: 2, kind: input, shape index: {}]   ;;  %s763_s3 = inlined_call_operand.hbm [shape: f32[32,8,128], index: 3, kind: output, shape index: {}]  }
   0x1   :  { %9 = vsyncpa [#allocation6], 0 }
   0x2   :  { %10 = vsyncpa [#allocation4], 0  ;;  %s654_s12 = smov [#allocation2]   ;;  %s582_s16 = scalar_lea.hbm %s760_s0, 4096 }
   0x3   :  { %s16_s13 = sshll.u32 %s654_s12, 4  ;;  %p583_p0 = scmp.ne.s32.totalorder %s760_s0, %s582_s16  ;;  %s17_s13 = int_to_ptr.vmem [resolvable:$true] %s16_s13 }
   0x4   :  { %p586_p1 = scmp.lt.u32.totalorder %s582_s16, %s760_s0 }
   0x6   :  { %p588_p2 = pnand %p586_p1, %p583_p0 }
   0x8   :  { %591 = shalt.err (!%p588_p2)
}
   0x9   :  { %s592_s21 = scalar_lea.vmem %s17_s13, 4096  ;;  %p597_p4 = scmp.lt.s32.totalorder %s17_s13, %s17_s13 }
   0xa   :  { %p593_p3 = scmp.ne.s32.totalorder %s17_s13, %s592_s21  ;;  %p598_p5 = scmp.lt.s32.totalorder %s592_s21, %s592_s21 }
   0xc   :  { %p599_p6 = por %p598_p5, %p597_p4 }
   0xe   :  { %p600_p7 = pnand %p599_p6, %p593_p3 }
  0x10   :  { %603 = shalt.err (!%p600_p7)
}
  0x11   :  { %s655_s22 = smov 128   ;;  %s656_s23 = smov 8  }
  0x12   :  { %22 = dma.hbm_to_vmem [thread:$0]  %s760_s0, 4096, %s17_s13, [#allocation3], %s655_s22, %s655_s22, %s656_s23  }
  0x13   :  { %s657_s26 = smov [#allocation5]   ;;  %s604_s30 = scalar_lea.hbm %s761_s1, 1024 }
  0x14   :  { %s28_s27 = sshll.u32 %s657_s26, 4  ;;  %p605_p8 = scmp.ne.s32.totalorder %s761_s1, %s604_s30  ;;  %s29_s27 = int_to_ptr.vmem [resolvable:$true] %s28_s27 }
  0x15   :  { %p608_p9 = scmp.lt.u32.totalorder %s604_s30, %s761_s1 }
  0x17   :  { %p610_p10 = pnand %p608_p9, %p605_p8 }
  0x19   :  { %613 = shalt.err (!%p610_p10)
}
  0x1a   :  { %s614_s8 = scalar_lea.vmem %s29_s27, 1024  ;;  %p619_p12 = scmp.lt.s32.totalorder %s29_s27, %s29_s27 }
  0x1b   :  { %p615_p11 = scmp.ne.s32.totalorder %s29_s27, %s614_s8  ;;  %p620_p13 = scmp.lt.s32.totalorder %s614_s8, %s614_s8 }
  0x1d   :  { %p621_p0 = por %p620_p13, %p619_p12 }
  0x1f   :  { %p622_p1 = pnand %p621_p0, %p615_p11 }
  0x21   :  { %625 = shalt.err (!%p622_p1)
}
  0x22   :  { %s658_s0 = smov 64   ;;  %s659_s9 = smov 4  }
  0x23   :  { %34 = dma.hbm_to_vmem [thread:$0]  %s761_s1, 1024, %s29_s27, [#allocation6], %s658_s0, %s658_s0, %s659_s9  }
  0x24   :  { %648 = dma.done.wait [#allocation3], 4096  }
  0x25   :  { %649 = vsyncadd [#allocation3], 4294963200 }
  0x26   :  { %650 = dma.done.wait [#allocation6], 1024  }
  0x27   :  { %651 = vsyncadd [#allocation6], 4294966272  ;;  %v510_v0 = vld [vmem:[#allocation5] sm:$0xff]   ;;  %v511_v1 = vld [vmem:[#allocation5 + $0x8] sm:$0xff]  }
  0x28   :  { %439 = vmatprep.subr.bf16.mxu0 %v510_v0  ;;  %487 = vmatprep.subr.bf16.mxu1 %v510_v0  ;;  %v512_v2 = vld [vmem:[#allocation5 + $0x10] sm:$0xff]   ;;  %v513_v3 = vld [vmem:[#allocation5 + $0x18] sm:$0xff]   ;;  %v44_v4 = vld [vmem:[#allocation2] sm:$0xff] }
  0x29   :  { %440 = vmatpush3.bf16.msra.mxu0 %v510_v0  ;;  %495 = vmatpush3.bf16.msra.mxu1 %v510_v0  ;;  %v45_v5 = vld [vmem:[#allocation2 + $0x8] sm:$0xff]  ;;  %v60_v6 = vld [vmem:[#allocation2 + $0x80] sm:$0xff]  ;;  %v516_v12 = vld [vmem:[#allocation5 + $0x30] sm:$0xff]  }
  0x2a   :  { %441 = vmatprep.subr.bf16.mxu0 %v511_v1  ;;  %488 = vmatprep.subr.bf16.mxu1 %v511_v1  ;;  %v76_v7 = vpack.c.bf16 %v45_v5, %v44_v4  ;;  %v61_v8 = vld [vmem:[#allocation2 + $0x88] sm:$0xff]  ;;  %v514_v10 = vld [vmem:[#allocation5 + $0x20] sm:$0xff]   ;;  %v517_v13 = vld [vmem:[#allocation5 + $0x38] sm:$0xff]  }
  0x2b   :  { %v84_v9 = vpack.c.bf16 %v61_v8, %v60_v6  ;;  %v515_v11 = vld [vmem:[#allocation5 + $0x28] sm:$0xff]   ;;  %v46_v14 = vld [vmem:[#allocation2 + $0x10] sm:$0xff]  ;;  %v47_v15 = vld [vmem:[#allocation2 + $0x18] sm:$0xff] }
  0x2c   :  { %455 = vmatprep.mubr.bf16.mxu0 %v76_v7  ;;  %v62_v16 = vld [vmem:[#allocation2 + $0x90] sm:$0xff]  ;;  %v63_v17 = vld [vmem:[#allocation2 + $0x98] sm:$0xff]  ;;  %v48_v18 = vld [vmem:[#allocation2 + $0x20] sm:$0xff]  ;;  %v77_v22 = vpack.c.bf16 %v47_v15, %v46_v14 }
  0x2d   :  { %442 = vmatpush3.bf16.msra.mxu0 %v511_v1  ;;  %496 = vmatpush3.bf16.msra.mxu1 %v511_v1  ;;  %v49_v19 = vld [vmem:[#allocation2 + $0x28] sm:$0xff]  ;;  %v64_v20 = vld [vmem:[#allocation2 + $0xa0] sm:$0xff]  ;;  %v85_v23 = vpack.c.bf16 %v63_v17, %v62_v16  ;;  %v50_v26 = vld [vmem:[#allocation2 + $0x30] sm:$0xff] }
  0x2e   :  { %443 = vmatprep.subr.bf16.mxu0 %v512_v2  ;;  %489 = vmatprep.subr.bf16.mxu1 %v512_v2  ;;  %v65_v21 = vld [vmem:[#allocation2 + $0xa8] sm:$0xff]  ;;  %v78_v24 = vpack.c.bf16 %v49_v19, %v48_v18  ;;  %v51_v27 = vld [vmem:[#allocation2 + $0x38] sm:$0xff]  ;;  %v66_v28 = vld [vmem:[#allocation2 + $0xb0] sm:$0xff] }
  0x2f   :  { %471 = vmatprep.mubr.bf16.mxu1 %v84_v9  ;;  %v86_v25 = vpack.c.bf16 %v65_v21, %v64_v20  ;;  %v67_v29 = vld [vmem:[#allocation2 + $0xb8] sm:$0xff]  ;;  %v52_v30 = vld [vmem:[#allocation2 + $0x40] sm:$0xff]  ;;  %v53_v31 = vld [vmem:[#allocation2 + $0x48] sm:$0xff]  ;;  %v79_v34 = vpack.c.bf16 %v51_v27, %v50_v26 }
  0x30   :  { %v68_v32 = vld [vmem:[#allocation2 + $0xc0] sm:$0xff]  ;;  %v69_v33 = vld [vmem:[#allocation2 + $0xc8] sm:$0xff]  ;;  %v87_v35 = vpack.c.bf16 %v67_v29, %v66_v28  ;;  %v80_v36 = vpack.c.bf16 %v53_v31, %v52_v30  ;;  %v54_v38 = vld [vmem:[#allocation2 + $0x50] sm:$0xff] }
  0x31   :  { %444 = vmatpush3.bf16.msra.mxu0 %v512_v2  ;;  %497 = vmatpush3.bf16.msra.mxu1 %v512_v2  ;;  %v88_v37 = vpack.c.bf16 %v69_v33, %v68_v32  ;;  %v55_v39 = vld [vmem:[#allocation2 + $0x58] sm:$0xff]  ;;  %v70_v40 = vld [vmem:[#allocation2 + $0xd0] sm:$0xff]  ;;  %v56_v42 = vld [vmem:[#allocation2 + $0x60] sm:$0xff] }
  0x32   :  { %445 = vmatprep.subr.bf16.mxu0 %v513_v3  ;;  %490 = vmatprep.subr.bf16.mxu1 %v513_v3  ;;  %v71_v41 = vld [vmem:[#allocation2 + $0xd8] sm:$0xff]  ;;  %v57_v43 = vld [vmem:[#allocation2 + $0x68] sm:$0xff]  ;;  %v72_v44 = vld [vmem:[#allocation2 + $0xe0] sm:$0xff]  ;;  %v81_v46 = vpack.c.bf16 %v55_v39, %v54_v38 }
  0x33   :  { %v73_v45 = vld [vmem:[#allocation2 + $0xe8] sm:$0xff]  ;;  %v89_v47 = vpack.c.bf16 %v71_v41, %v70_v40  ;;  %v82_v48 = vpack.c.bf16 %v57_v43, %v56_v42  ;;  %v58_v50 = vld [vmem:[#allocation2 + $0x70] sm:$0xff]  ;;  %v59_v51 = vld [vmem:[#allocation2 + $0x78] sm:$0xff] }
  0x34   :  { %v90_v49 = vpack.c.bf16 %v73_v45, %v72_v44  ;;  %v74_v52 = vld [vmem:[#allocation2 + $0xf0] sm:$0xff]  ;;  %v75_v53 = vld [vmem:[#allocation2 + $0xf8] sm:$0xff]  ;;  %v83_v54 = vpack.c.bf16 %v59_v51, %v58_v50  ;;  %v711_v56 = vld [vmem:[%s762_s2] ss:$0 sm:$0xff]  ;;  %s660_s2 = smov [#allocation7]  }
  0x35   :  { %446 = vmatpush3.bf16.msra.mxu0 %v513_v3  ;;  %498 = vmatpush3.bf16.msra.mxu1 %v513_v3  ;;  %v91_v55 = vpack.c.bf16 %v75_v53, %v74_v52  ;;  %s393_s13 = sshll.u32 %s660_s2, 4  ;;  %s394_s13 = int_to_ptr.vmem [resolvable:$true] %s393_s13 }
  0x36   :  { %447 = vmatprep.subr.bf16.mxu0 %v514_v10  ;;  %491 = vmatprep.subr.bf16.mxu1 %v514_v10  ;;  %s626_s14 = scalar_lea.vmem %s394_s13, 4096  ;;  %p631_p3 = scmp.lt.s32.totalorder %s394_s13, %s394_s13 }
  0x37   :  { %p627_p2 = scmp.ne.s32.totalorder %s394_s13, %s626_s14  ;;  %p632_p4 = scmp.lt.s32.totalorder %s626_s14, %s626_s14 }
  0x39   :  { %448 = vmatpush3.bf16.msra.mxu0 %v514_v10  ;;  %499 = vmatpush3.bf16.msra.mxu1 %v514_v10  ;;  %p633_p5 = por %p632_p4, %p631_p3 }
  0x3a   :  { %449 = vmatprep.subr.bf16.mxu0 %v515_v11  ;;  %492 = vmatprep.subr.bf16.mxu1 %v515_v11 }
  0x3b   :  { %p634_p6 = pnand %p633_p5, %p627_p2 }
  0x3d   :  { %450 = vmatpush3.bf16.msra.mxu0 %v515_v11  ;;  %500 = vmatpush3.bf16.msra.mxu1 %v515_v11 }
  0x3e   :  { %451 = vmatprep.subr.bf16.mxu0 %v516_v12  ;;  %493 = vmatprep.subr.bf16.mxu1 %v516_v12 }
  0x41   :  { %452 = vmatpush3.bf16.msra.mxu0 %v516_v12  ;;  %501 = vmatpush3.bf16.msra.mxu1 %v516_v12 }
  0x42   :  { %453 = vmatprep.subr.bf16.mxu0 %v517_v13  ;;  %494 = vmatprep.subr.bf16.mxu1 %v517_v13 }
  0x45   :  { %454 = vmatpush3.bf16.msra.mxu0 %v517_v13  ;;  %502 = vmatpush3.bf16.msra.mxu1 %v517_v13 }
  0x48   :  { %456 = vmatmul.mubr.bf16.vlgmr.msra.gmra.mrb[0].mxu0 %v77_v22  ;;  %472 = vmatmul.mubr.bf16.vlgmr.msra.gmra.mrb[0].mxu1 %v85_v23 }
  0x49   :  { %459 = vmatprep.mubr.bf16.mxu0 %v78_v24  ;;  %475 = vmatprep.mubr.bf16.mxu1 %v86_v25 }
  0x50   :  { %460 = vmatmul.mubr.bf16.gmra.mrb[4].mxu0 %v79_v34  ;;  %476 = vmatmul.mubr.bf16.gmra.mrb[4].mxu1 %v87_v35 }
  0x51   :  { %463 = vmatprep.mubr.bf16.mxu0 %v80_v36  ;;  %479 = vmatprep.mubr.bf16.mxu1 %v88_v37 }
  0x58   :  { %464 = vmatmul.mubr.bf16.gmra.mrb[8].mxu0 %v81_v46  ;;  %480 = vmatmul.mubr.bf16.gmra.mrb[8].mxu1 %v89_v47 }
  0x59   :  { %467 = vmatprep.mubr.bf16.mxu0 %v82_v48  ;;  %483 = vmatprep.mubr.bf16.mxu1 %v90_v49 }
  0x60   :  { %468 = vmatmul.mubr.bf16.gmra.mrb[12].mxu0 %v83_v54  ;;  %484 = vmatmul.mubr.bf16.gmra.mrb[12].mxu1 %v91_v55 }
 0x11b   :  { %v457_v57 = vpop.f32.mrb[0].mxu0  ;;  %v473_v58 = vpop.f32.mrb[0].mxu1 }
 0x11c   :  { %v206_v59 = vadd.f32 %v457_v57, %v711_v56  ;;  %v270_v60 = vadd.f32 %v473_v58, %v711_v56  ;;  %v197_v61 = vpop.f32.mrb[1].mxu0  ;;  %v261_v62 = vpop.f32.mrb[1].mxu1 }
 0x11d   :  { %v198_v63 = vadd.f32 %v711_v56, %v197_v61  ;;  %v262_v0 = vadd.f32 %v711_v56, %v261_v62  ;;  %v458_v1 = vpop.f32.mrb[2].mxu0  ;;  %v474_v2 = vpop.f32.mrb[2].mxu1 }
 0x11e   :  { %518 = vtanh.f32 %v206_v59  ;;  %v209_v3 = vadd.f32 %v458_v1, %v711_v56  ;;  %v200_v4 = vpop.f32.mrb[3].mxu0  ;;  %v264_v5 = vpop.f32.mrb[3].mxu1  ;;  %v273_v6 = vadd.f32 %v474_v2, %v711_v56 }
 0x11f   :  { %520 = vtanh.f32 %v270_v60  ;;  %v201_v7 = vadd.f32 %v711_v56, %v200_v4  ;;  %v265_v8 = vadd.f32 %v711_v56, %v264_v5 }
 0x120   :  { %522 = vtanh.f32 %v198_v63 }
 0x121   :  { %524 = vtanh.f32 %v262_v0 }
 0x122   :  { %526 = vtanh.f32 %v209_v3 }
 0x123   :  { %528 = vtanh.f32 %v273_v6  ;;  %v461_v9 = vpop.f32.mrb[4].mxu0  ;;  %v477_v10 = vpop.f32.mrb[4].mxu1 }
 0x124   :  { %530 = vtanh.f32 %v201_v7  ;;  %v222_v11 = vadd.f32 %v461_v9, %v711_v56  ;;  %v286_v12 = vadd.f32 %v477_v10, %v711_v56  ;;  %v213_v13 = vpop.f32.mrb[5].mxu0  ;;  %v277_v14 = vpop.f32.mrb[5].mxu1 }
 0x125   :  { %532 = vtanh.f32 %v265_v8  ;;  %v214_v15 = vadd.f32 %v711_v56, %v213_v13  ;;  %v278_v16 = vadd.f32 %v711_v56, %v277_v14  ;;  %v462_v17 = vpop.f32.mrb[6].mxu0  ;;  %v478_v18 = vpop.f32.mrb[6].mxu1 }
 0x126   :  { %534 = vtanh.f32 %v222_v11  ;;  %v225_v19 = vadd.f32 %v462_v17, %v711_v56  ;;  %v216_v20 = vpop.f32.mrb[7].mxu0  ;;  %v280_v21 = vpop.f32.mrb[7].mxu1  ;;  %v289_v22 = vadd.f32 %v478_v18, %v711_v56 }
 0x127   :  { %536 = vtanh.f32 %v286_v12  ;;  %v217_v24 = vadd.f32 %v711_v56, %v216_v20  ;;  %v281_v26 = vadd.f32 %v711_v56, %v280_v21 }
 0x128   :  { %v519_v23 = vpop.eup %518  ;;  %538 = vtanh.f32 %v214_v15 }
 0x129   :  { %v521_v25 = vpop.eup %520  ;;  %358 = vst [vmem:[#allocation7 + $0x10] sm:$0xff] %v519_v23  ;;  %540 = vtanh.f32 %v278_v16 }
 0x12a   :  { %v523_v27 = vpop.eup %522  ;;  %374 = vst [vmem:[#allocation7 + $0x90] sm:$0xff] %v521_v25  ;;  %542 = vtanh.f32 %v225_v19 }
 0x12b   :  { %v525_v28 = vpop.eup %524  ;;  %356 = vst [vmem:[#allocation7] sm:$0xff] %v523_v27  ;;  %544 = vtanh.f32 %v289_v22  ;;  %v465_v29 = vpop.f32.mrb[8].mxu0 }
 0x12c   :  { %v481_v30 = vpop.f32.mrb[8].mxu1  ;;  %v527_v31 = vpop.eup %526  ;;  %372 = vst [vmem:[#allocation7 + $0x80] sm:$0xff] %v525_v28  ;;  %546 = vtanh.f32 %v217_v24  ;;  %v238_v32 = vadd.f32 %v465_v29, %v711_v56 }
 0x12d   :  { %v302_v33 = vadd.f32 %v481_v30, %v711_v56  ;;  %v229_v34 = vpop.f32.mrb[9].mxu0  ;;  %v293_v35 = vpop.f32.mrb[9].mxu1  ;;  %359 = vst [vmem:[#allocation7 + $0x18] sm:$0xff] %v527_v31  ;;  %548 = vtanh.f32 %v281_v26 }
 0x12e   :  { %v529_v36 = vpop.eup %528  ;;  %v230_v37 = vadd.f32 %v711_v56, %v229_v34  ;;  %v294_v38 = vadd.f32 %v711_v56, %v293_v35  ;;  %v466_v39 = vpop.f32.mrb[10].mxu0  ;;  %550 = vtanh.f32 %v238_v32 }
 0x12f   :  { %v482_v40 = vpop.f32.mrb[10].mxu1  ;;  %v531_v41 = vpop.eup %530  ;;  %375 = vst [vmem:[#allocation7 + $0x98] sm:$0xff] %v529_v36  ;;  %v241_v42 = vadd.f32 %v466_v39, %v711_v56  ;;  %552 = vtanh.f32 %v302_v33 }
 0x130   :  { %v232_v43 = vpop.f32.mrb[11].mxu0  ;;  %v296_v44 = vpop.f32.mrb[11].mxu1  ;;  %357 = vst [vmem:[#allocation7 + $0x8] sm:$0xff] %v531_v41  ;;  %v305_v46 = vadd.f32 %v482_v40, %v711_v56  ;;  %554 = vtanh.f32 %v230_v37 }
 0x131   :  { %v533_v45 = vpop.eup %532  ;;  %v233_v48 = vadd.f32 %v711_v56, %v232_v43  ;;  %556 = vtanh.f32 %v294_v38  ;;  %v297_v50 = vadd.f32 %v711_v56, %v296_v44 }
 0x132   :  { %v535_v47 = vpop.eup %534  ;;  %373 = vst [vmem:[#allocation7 + $0x88] sm:$0xff] %v533_v45  ;;  %558 = vtanh.f32 %v241_v42 }
 0x133   :  { %v537_v49 = vpop.eup %536  ;;  %362 = vst [vmem:[#allocation7 + $0x30] sm:$0xff] %v535_v47  ;;  %560 = vtanh.f32 %v305_v46  ;;  %v469_v53 = vpop.f32.mrb[12].mxu0 }
 0x134   :  { %v539_v51 = vpop.eup %538  ;;  %378 = vst [vmem:[#allocation7 + $0xb0] sm:$0xff] %v537_v49  ;;  %v485_v54 = vpop.f32.mrb[12].mxu1  ;;  %562 = vtanh.f32 %v233_v48  ;;  %v254_v57 = vadd.f32 %v469_v53, %v711_v56 }
 0x135   :  { %v541_v52 = vpop.eup %540  ;;  %360 = vst [vmem:[#allocation7 + $0x20] sm:$0xff] %v539_v51  ;;  %v318_v58 = vadd.f32 %v485_v54, %v711_v56  ;;  %v245_v59 = vpop.f32.mrb[13].mxu0  ;;  %564 = vtanh.f32 %v297_v50 }
 0x136   :  { %v543_v55 = vpop.eup %542  ;;  %376 = vst [vmem:[#allocation7 + $0xa0] sm:$0xff] %v541_v52  ;;  %v309_v60 = vpop.f32.mrb[13].mxu1  ;;  %v246_v62 = vadd.f32 %v711_v56, %v245_v59  ;;  %566 = vtanh.f32 %v254_v57 }
 0x137   :  { %v545_v61 = vpop.eup %544  ;;  %363 = vst [vmem:[#allocation7 + $0x38] sm:$0xff] %v543_v55  ;;  %v310_v63 = vadd.f32 %v711_v56, %v309_v60  ;;  %v470_v0 = vpop.f32.mrb[14].mxu0  ;;  %568 = vtanh.f32 %v318_v58 }
 0x138   :  { %v486_v1 = vpop.f32.mrb[14].mxu1  ;;  %v547_v2 = vpop.eup %546  ;;  %379 = vst [vmem:[#allocation7 + $0xb8] sm:$0xff] %v545_v61  ;;  %v257_v3 = vadd.f32 %v470_v0, %v711_v56  ;;  %570 = vtanh.f32 %v246_v62 }
 0x139   :  { %v248_v4 = vpop.f32.mrb[15].mxu0  ;;  %v312_v5 = vpop.f32.mrb[15].mxu1  ;;  %361 = vst [vmem:[#allocation7 + $0x28] sm:$0xff] %v547_v2  ;;  %v321_v7 = vadd.f32 %v486_v1, %v711_v56  ;;  %572 = vtanh.f32 %v310_v63 }
 0x13a   :  { %v549_v6 = vpop.eup %548  ;;  %v249_v9 = vadd.f32 %v711_v56, %v248_v4  ;;  %v313_v11 = vadd.f32 %v711_v56, %v312_v5  ;;  %574 = vtanh.f32 %v257_v3 }
 0x13b   :  { %v551_v8 = vpop.eup %550  ;;  %377 = vst [vmem:[#allocation7 + $0xa8] sm:$0xff] %v549_v6  ;;  %576 = vtanh.f32 %v321_v7 }
 0x13c   :  { %v553_v10 = vpop.eup %552  ;;  %366 = vst [vmem:[#allocation7 + $0x50] sm:$0xff] %v551_v8  ;;  %578 = vtanh.f32 %v249_v9 }
 0x13d   :  { %v555_v12 = vpop.eup %554  ;;  %382 = vst [vmem:[#allocation7 + $0xd0] sm:$0xff] %v553_v10  ;;  %580 = vtanh.f32 %v313_v11 }
 0x13e   :  { %v557_v13 = vpop.eup %556  ;;  %364 = vst [vmem:[#allocation7 + $0x40] sm:$0xff] %v555_v12 }
 0x13f   :  { %v559_v14 = vpop.eup %558  ;;  %380 = vst [vmem:[#allocation7 + $0xc0] sm:$0xff] %v557_v13 }
 0x140   :  { %v561_v15 = vpop.eup %560  ;;  %367 = vst [vmem:[#allocation7 + $0x58] sm:$0xff] %v559_v14 }
 0x141   :  { %v563_v16 = vpop.eup %562  ;;  %383 = vst [vmem:[#allocation7 + $0xd8] sm:$0xff] %v561_v15 }
 0x142   :  { %v565_v17 = vpop.eup %564  ;;  %365 = vst [vmem:[#allocation7 + $0x48] sm:$0xff] %v563_v16 }
 0x143   :  { %v567_v18 = vpop.eup %566  ;;  %381 = vst [vmem:[#allocation7 + $0xc8] sm:$0xff] %v565_v17 }
 0x144   :  { %v569_v19 = vpop.eup %568  ;;  %370 = vst [vmem:[#allocation7 + $0x70] sm:$0xff] %v567_v18 }
 0x145   :  { %v571_v56 = vpop.eup %570  ;;  %386 = vst [vmem:[#allocation7 + $0xf0] sm:$0xff] %v569_v19 }
 0x146   :  { %v573_v20 = vpop.eup %572  ;;  %368 = vst [vmem:[#allocation7 + $0x60] sm:$0xff] %v571_v56 }
 0x147   :  { %v575_v21 = vpop.eup %574  ;;  %384 = vst [vmem:[#allocation7 + $0xe0] sm:$0xff] %v573_v20 }
 0x148   :  { %v577_v22 = vpop.eup %576  ;;  %371 = vst [vmem:[#allocation7 + $0x78] sm:$0xff] %v575_v21 }
 0x149   :  { %v579_v23 = vpop.eup %578  ;;  %387 = vst [vmem:[#allocation7 + $0xf8] sm:$0xff] %v577_v22 }
 0x14a   :  { %v581_v24 = vpop.eup %580  ;;  %369 = vst [vmem:[#allocation7 + $0x68] sm:$0xff] %v579_v23 }
 0x14b   :  { %385 = vst [vmem:[#allocation7 + $0xe8] sm:$0xff] %v581_v24 }
 0x14c   :  { %637 = shalt.err (!%p634_p6)
}
 0x14d   :  { %s638_s17 = scalar_lea.hbm %s763_s3, 4096 }
 0x14e   :  { %p639_p7 = scmp.ne.s32.totalorder %s763_s3, %s638_s17  ;;  %p642_p8 = scmp.lt.u32.totalorder %s638_s17, %s763_s3 }
 0x150   :  { %p644_p9 = pnand %p642_p8, %p639_p7 }
 0x152   :  { %647 = shalt.err (!%p644_p9)
}
 0x153   :  { %399 = dma.vmem_to_hbm [thread:$0]  %s394_s13, 4096, %s763_s3, [#allocation4], %s655_s22, %s655_s22, %s656_s23  }
 0x154   :  { %652 = dma.done.wait [#allocation4], 4096  }
 0x155   :  { %653 = vsyncadd [#allocation4], 4294963200 }
 0x156   :  { %403 = vsyncpa [#allocation3], 1 }
 0x157   :  { %404 = vsyncpa [#allocation6], 1 }
 0x158   :  { %405 = vsyncpa [#allocation4], 1 }

</bundles_post_ra>
